<compile_context>
chip_gen: v7x
topology: tpu7x:2x2x1
jax: 0.10.0
libtpu: 0.0.40
codegen_flags: <defaults>
</compile_context>

<pallas_src>
import functools

import jax
import jax.numpy as jnp
from jax.experimental import pallas as pl
from jax.experimental.pallas import tpu as pltpu

UNIT_EMBEDDING = 10
CONTROL_GROUP_SIZE = 2 * UNIT_EMBEDDING + 1   # 21
SIMPLE_LAYER = 64
NUM_UNIT_TYPES = 32                           # stands in for max(sd.UNIT_TYPES) + 1
LN_EPS = 1e-5


# ---------------------------------------------------------------------------
# Pallas kernel: y = LayerNorm(ReLU(x @ W + b)) * gamma + beta   (norm=True)
#                y = ReLU(x @ W + b)                             (norm=False)
# p_ref rows: 0 = bias, 1 = ln_gamma, 2 = ln_beta (rows 3..7 are padding).
# ---------------------------------------------------------------------------
def _cg_kernel(x_ref, w_ref, p_ref, o_ref, *, norm: bool):
    x = x_ref[...]                                        # (TM, 210) f32
    h = jnp.dot(x, w_ref[...], preferred_element_type=jnp.float32)
    h = h + p_ref[0:1, :]                                 # bias  (1, 64)
    h = jnp.maximum(h, 0.0)                               # ReLU
    if norm:
        mean = jnp.mean(h, axis=-1, keepdims=True)        # reduce over 64
        cent = h - mean
        var = jnp.mean(cent * cent, axis=-1, keepdims=True)
        h = cent * jax.lax.rsqrt(var + LN_EPS)
        h = h * p_ref[1:2, :] + p_ref[2:3, :]             # gamma, beta
    o_ref[...] = h.astype(o_ref.dtype)


def _round_up(v, m):
    return ((v + m - 1) // m) * m


def _cg_mlp_pallas(x2d, w, b, gamma, beta, norm=True, tile_m=512):
    M, K = x2d.shape
    N = w.shape[1]

    # Pack b / gamma / beta into one sublane-padded (8, N) block -> single DMA.
    packed = jnp.zeros((8, N), jnp.float32)
    packed = packed.at[0].set(b).at[1].set(gamma).at[2].set(beta)

    tm = min(tile_m, _round_up(M, 8))                     # multiple of 8
    grid = (pl.cdiv(M, tm),)

    return pl.pallas_call(
        functools.partial(_cg_kernel, norm=norm),
        out_shape=jax.ShapeDtypeStruct((M, N), jnp.float32),
        grid_spec=pl.GridSpec(
            grid=grid,
            in_specs=[
                pl.BlockSpec((tm, K), lambda i: (i, 0)),   # streamed x tiles
                pl.BlockSpec((K, N), lambda i: (0, 0)),    # resident weights
                pl.BlockSpec((8, N), lambda i: (0, 0)),    # resident b/g/beta
            ],
            out_specs=pl.BlockSpec((tm, N), lambda i: (i, 0)),
        ),
        compiler_params=pltpu.CompilerParams(
            # Tiled rows are independent -> shard across v7x's 2 TCs;
            # neutral on single-TC v5e/v6e.
            dimension_semantics=("parallel",)),
    )(x2d, w, packed)


# ---------------------------------------------------------------------------
# Module: parameters + forward
# ---------------------------------------------------------------------------
def init_params(key):
    k_emb, k_w, k_b, k_g, k_beta = jax.random.split(key, 5)
    in_features = CONTROL_GROUP_SIZE * 10      # 210
    params = {
        "emb_table": jax.random.normal(k_emb, (NUM_UNIT_TYPES, UNIT_EMBEDDING),
                                       jnp.float32) * 0.1,
        "w": jax.random.normal(k_w, (in_features, SIMPLE_LAYER),
                               jnp.float32) * (1.0 / jnp.sqrt(in_features)),
        "b": jax.random.normal(k_b, (SIMPLE_LAYER,), jnp.float32) * 0.01,
        "ln_gamma": 1.0 + 0.1 * jax.random.normal(k_g, (SIMPLE_LAYER,), jnp.float32),
        "ln_beta": 0.1 * jax.random.normal(k_beta, (SIMPLE_LAYER,), jnp.float32),
    }
    return params


def control_groups_input_forward(params, x, hint, norm=True):
    """x: (B, S, 10, 2) float32, hint: (Bh, S, 10, 2) float32, Bh divides B."""
    B, S, G, F = x.shape
    assert G == 10

    # nn.Embedding lookups (gather — done as JAX glue).
    ids = x[..., 0].astype(jnp.int32)                       # (B, S, 10)
    hint_ids = hint[..., 0].astype(jnp.int32)               # (Bh, S, 10)
    embedded = params["emb_table"][ids]                     # (B, S, 10, 10)
    embedded_hint = params["emb_table"][hint_ids]           # (Bh, S, 10, 10)
    reps = B // hint.shape[0]
    embedded_hint = jnp.tile(embedded_hint, (reps, 1, 1, 1))  # (B, S, 10, 10)

    # concat -> (B, S, 10, 21) == bypass
    bypass = jnp.concatenate(
        [embedded, x[..., 1:].astype(jnp.float32), embedded_hint], axis=-1)

    # flatten last two dims -> (B*S, 210), then Linear+ReLU+LayerNorm in Pallas
    x2d = bypass.reshape(B * S, 10 * CONTROL_GROUP_SIZE)
    out2d = _cg_mlp_pallas(x2d, params["w"], params["b"],
                           params["ln_gamma"], params["ln_beta"], norm=norm)
    out = out2d.reshape(B, S, SIMPLE_LAYER)
    return out, bypass


# Pure-JAX reference for verification.
def _reference(params, x, hint, norm=True):
    B, S, G, F = x.shape
    ids = x[..., 0].astype(jnp.int32)
    hint_ids = hint[..., 0].astype(jnp.int32)
    embedded = params["emb_table"][ids]
    embedded_hint = jnp.tile(params["emb_table"][hint_ids],
                             (B // hint.shape[0], 1, 1, 1))
    bypass = jnp.concatenate(
        [embedded, x[..., 1:].astype(jnp.float32), embedded_hint], axis=-1)
    h = bypass.reshape(B, S, 10 * CONTROL_GROUP_SIZE) @ params["w"] + params["b"]
    h = jnp.maximum(h, 0.0)
    if norm:
        mean = jnp.mean(h, axis=-1, keepdims=True)
        var = jnp.mean((h - mean) ** 2, axis=-1, keepdims=True)
        h = (h - mean) / jnp.sqrt(var + LN_EPS)
        h = h * params["ln_gamma"] + params["ln_beta"]
    return h, bypass


if __name__ == "__main__":
    key = jax.random.PRNGKey(0)
    k_param, k_xid, k_xf, k_hid, k_hf = jax.random.split(key, 5)
    params = init_params(k_param)

    B, S = 2, 8
    # feature 0: integer unit-type id, feature 1: float feature
    x_ids = jax.random.randint(k_xid, (B, S, 10, 1), 0, NUM_UNIT_TYPES)
    x_feat = jax.random.normal(k_xf, (B, S, 10, 1), jnp.float32)
    x = jnp.concatenate([x_ids.astype(jnp.float32), x_feat], axis=-1)   # (2, 8, 10, 2)

    h_ids = jax.random.randint(k_hid, (1, S, 10, 1), 0, NUM_UNIT_TYPES)
    h_feat = jax.random.normal(k_hf, (1, S, 10, 1), jnp.float32)
    hint = jnp.concatenate([h_ids.astype(jnp.float32), h_feat], axis=-1)  # (1, 8, 10, 2)

    out, bypass = control_groups_input_forward(params, x, hint, norm=True)
    jax.block_until_ready((out, bypass))

    ref_out, ref_bypass = _reference(params, x, hint, norm=True)
    assert out.shape == (B, S, SIMPLE_LAYER)
    assert bypass.shape == (B, S, 10, CONTROL_GROUP_SIZE)
    assert jnp.allclose(out, ref_out, atol=1e-4, rtol=1e-4)
    assert jnp.allclose(bypass, ref_bypass, atol=1e-6, rtol=1e-6)

    # also exercise the norm=False path (pure Linear+ReLU)
    out_nn, _ = control_groups_input_forward(params, x, hint, norm=False)
    ref_nn, _ = _reference(params, x, hint, norm=False)
    jax.block_until_ready(out_nn)
    assert jnp.allclose(out_nn, ref_nn, atol=1e-4, rtol=1e-4)

    print("KERNEL_OK")
</pallas_src>

<mosaic_0001>
module attributes {stable_mosaic.version = 11 : i64} {
  func.func @_cg_kernel(%arg0: i32, %arg1: memref<16x210xf32, #tpu.memory_space<vmem>>, %arg2: memref<210x64xf32, #tpu.memory_space<vmem>>, %arg3: memref<8x64xf32, #tpu.memory_space<vmem>>, %arg4: memref<16x64xf32, #tpu.memory_space<vmem>>) attributes {dimension_semantics = [#tpu.dimension_semantics<parallel>], iteration_bounds = array<i64: 1>, scalar_prefetch = 0 : i64, scratch_operands = 0 : i64, tpu.core_type = #tpu.core_type<tc>, window_params = [{transform_indices = @transform_0, window_bounds = array<i64: 16, 210>}, {pipeline_mode = #tpu.pipeline_mode<synchronous>, transform_indices = @transform_1, window_bounds = array<i64: 210, 64>}, {pipeline_mode = #tpu.pipeline_mode<synchronous>, transform_indices = @transform_2, window_bounds = array<i64: 8, 64>}, {transform_indices = @transform_3, window_bounds = array<i64: 16, 64>}]} {
    %c0 = arith.constant 0 : index
    %c0_0 = arith.constant 0 : index
    %0 = vector.load %arg1[%c0, %c0_0] : memref<16x210xf32, #tpu.memory_space<vmem>>, vector<16x210xf32>
    %c0_1 = arith.constant 0 : index
    %c0_2 = arith.constant 0 : index
    %1 = vector.load %arg2[%c0_1, %c0_2] : memref<210x64xf32, #tpu.memory_space<vmem>>, vector<210x64xf32>
    %cst = arith.constant dense<0.000000e+00> : vector<16x64xf32>
    %2 = tpu.matmul %0, %1, %cst {dimension_numbers = #tpu.dot_dimension_numbers<[1], [0], [0], [1], [0, 0, 1, 1], [], []>} : vector<16x210xf32>, vector<210x64xf32>, vector<16x64xf32> -> vector<16x64xf32>
    %c0_3 = arith.constant 0 : index
    %c0_4 = arith.constant 0 : index
    %3 = vector.load %arg3[%c0_3, %c0_4] : memref<8x64xf32, #tpu.memory_space<vmem>>, vector<1x64xf32>
    %4 = vector.broadcast %3 : vector<1x64xf32> to vector<16x64xf32>
    %5 = arith.addf %2, %4 : vector<16x64xf32>
    %cst_5 = arith.constant 0.000000e+00 : f32
    %6 = vector.broadcast %cst_5 : f32 to vector<16x64xf32>
    %7 = arith.maximumf %5, %6 : vector<16x64xf32>
    %cst_6 = arith.constant dense<0.000000e+00> : vector<16xf32>
    %8 = vector.multi_reduction <add>, %7, %cst_6 [1] : vector<16x64xf32> to vector<16xf32>
    %9 = vector.shape_cast %8 : vector<16xf32> to vector<16x1xf32>
    %cst_7 = arith.constant 6.400000e+01 : f32
    %10 = vector.broadcast %cst_7 : f32 to vector<16x1xf32>
    %11 = arith.divf %9, %10 : vector<16x1xf32>
    %12 = vector.broadcast %11 : vector<16x1xf32> to vector<16x64xf32>
    %13 = arith.subf %7, %12 : vector<16x64xf32>
    %14 = arith.mulf %13, %13 : vector<16x64xf32>
    %cst_8 = arith.constant dense<0.000000e+00> : vector<16xf32>
    %15 = vector.multi_reduction <add>, %14, %cst_8 [1] : vector<16x64xf32> to vector<16xf32>
    %16 = vector.shape_cast %15 : vector<16xf32> to vector<16x1xf32>
    %cst_9 = arith.constant 6.400000e+01 : f32
    %17 = vector.broadcast %cst_9 : f32 to vector<16x1xf32>
    %18 = arith.divf %16, %17 : vector<16x1xf32>
    %cst_10 = arith.constant 9.99999974E-6 : f32
    %19 = vector.broadcast %cst_10 : f32 to vector<16x1xf32>
    %20 = arith.addf %18, %19 : vector<16x1xf32>
    %21 = math.rsqrt %20 : vector<16x1xf32>
    %22 = vector.broadcast %21 : vector<16x1xf32> to vector<16x64xf32>
    %23 = arith.mulf %13, %22 : vector<16x64xf32>
    %c1 = arith.constant 1 : index
    %c0_11 = arith.constant 0 : index
    %24 = vector.load %arg3[%c1, %c0_11] : memref<8x64xf32, #tpu.memory_space<vmem>>, vector<1x64xf32>
    %25 = vector.broadcast %24 : vector<1x64xf32> to vector<16x64xf32>
    %26 = arith.mulf %23, %25 : vector<16x64xf32>
    %c2 = arith.constant 2 : index
    %c0_12 = arith.constant 0 : index
    %27 = vector.load %arg3[%c2, %c0_12] : memref<8x64xf32, #tpu.memory_space<vmem>>, vector<1x64xf32>
    %28 = vector.broadcast %27 : vector<1x64xf32> to vector<16x64xf32>
    %29 = arith.addf %26, %28 : vector<16x64xf32>
    %c0_13 = arith.constant 0 : index
    %c0_14 = arith.constant 0 : index
    %30 = vector.load %arg4[%c0_13, %c0_14] : memref<16x64xf32, #tpu.memory_space<vmem>>, vector<16x64xf32>
    tpu.vector_store %arg4[%c0_13, %c0_14], %29 {strides = array<i32>} : memref<16x64xf32, #tpu.memory_space<vmem>>, vector<16x64xf32>,
    return
  }
  func.func @transform_0(%arg0: i32) -> (i32, i32) {
    %c0_i32 = arith.constant 0 : i32
    %c0_i32_0 = arith.constant 0 : i32
    return %arg0, %c0_i32 : i32, i32
  }
  func.func @transform_1(%arg0: i32) -> (i32, i32) {
    %c0_i32 = arith.constant 0 : i32
    %c0_i32_0 = arith.constant 0 : i32
    %c0_i32_1 = arith.constant 0 : i32
    return %c0_i32, %c0_i32_0 : i32, i32
  }
  func.func @transform_2(%arg0: i32) -> (i32, i32) {
    %c0_i32 = arith.constant 0 : i32
    %c0_i32_0 = arith.constant 0 : i32
    %c0_i32_1 = arith.constant 0 : i32
    return %c0_i32, %c0_i32_0 : i32, i32
  }
  func.func @transform_3(%arg0: i32) -> (i32, i32) {
    %c0_i32 = arith.constant 0 : i32
    %c0_i32_0 = arith.constant 0 : i32
    return %arg0, %c0_i32 : i32, i32
  }
}

</mosaic_0001>

<bundles_post_ra>
// kernel: tpu_custom_call.1
= control target key start
LH: loop header
LB: loop body
LE: loop exit
PB: predicated region body
PF: predicated region fallthrough
CT: control target
= control target key end

     0   :  { %v305_v3 = vmov 0.0|0.0   ;;  %vm51_vm0 = vcmask 670720   ;;  %s476_s0 = inlined_call_operand.vmem [shape: f32[16,210], index: 0, kind: input, shape index: {}]   ;;  %s477_s1 = inlined_call_operand.vmem [shape: f32[210,64], index: 1, kind: input, shape index: {}]   ;;  %s478_s2 = inlined_call_operand.vmem [shape: f32[8,64], index: 2, kind: input, shape index: {}]   ;;  %s479_s3 = inlined_call_operand.hbm [shape: f32[16,64], index: 3, kind: output, shape index: {}]  }
   0x1   :  { %v19_v0 = vld [vmem:[%s477_s1] sm:$0xff]  ;;  %v20_v1 = vld [vmem:[%s477_s1 + $0x8] sm:$0xff]  ;;  %v21_v2 = vld [vmem:[%s477_s1 + $0x10] sm:$0xff]  ;;  %205 = vmatprep.subr.bf16.mxu0 %v305_v3  ;;  %244 = vmatprep.subr.bf16.mxu1 %v305_v3 }
   0x2   :  { %v206_v4 = vpack.c.bf16 %v20_v1, %v19_v0  ;;  %v22_v5 = vld [vmem:[%s477_s1 + $0x18] sm:$0xff]  ;;  %v23_v7 = vld [vmem:[%s477_s1 + $0x20] sm:$0xff]  ;;  %v24_v8 = vld [vmem:[%s477_s1 + $0x28] sm:$0xff] }
   0x3   :  { %v209_v6 = vpack.c.bf16 %v22_v5, %v21_v2  ;;  %v212_v9 = vpack.c.bf16 %v24_v8, %v23_v7  ;;  %v25_v10 = vld [vmem:[%s477_s1 + $0x30] sm:$0xff]  ;;  %v26_v11 = vld [vmem:[%s477_s1 + $0x38] sm:$0xff]  ;;  %v16_v12 = vld [vmem:[%s476_s0 + $0x8] sm:$0xff] }
   0x4   :  { %207 = vmatpush1.bf16.msra.mxu0 %v206_v4  ;;  %258 = vmatpush1.bf16.msra.mxu1 %v206_v4  ;;  %v18_v13 = vld [vmem:[%s476_s0 + $0x18] sm:$0xff] }
   0x5   :  { %208 = vmatprep.subr.bf16.mxu0 %v305_v3  ;;  %245 = vmatprep.subr.bf16.mxu1 %v305_v3 }
   0x6   :  { %201 = vmatprep.mubr.msk.f32.mxu0 %vm51_vm0, %v16_v12  ;;  %202 = vmatprep.mubr.msk.f32.mxu1 %vm51_vm0, %v18_v13 }
   0x8   :  { %210 = vmatpush1.bf16.msra.mxu0 %v209_v6  ;;  %259 = vmatpush1.bf16.msra.mxu1 %v209_v6 }
   0x9   :  { %211 = vmatprep.subr.bf16.mxu0 %v305_v3  ;;  %246 = vmatprep.subr.bf16.mxu1 %v305_v3 }
   0xa   :  { %8 = vsyncpa [#allocation3], 0  ;;  %v215_v14 = vpack.c.bf16 %v26_v11, %v25_v10  ;;  %v27_v15 = vld [vmem:[%s477_s1 + $0x40] sm:$0xff]  ;;  %v28_v16 = vld [vmem:[%s477_s1 + $0x48] sm:$0xff]  ;;  %v306_v42 = vmov 0.0   ;;  %vm58_vm1 = vcmask 1041408  }
   0xb   :  { %v218_v17 = vpack.c.bf16 %v28_v16, %v27_v15  ;;  %v29_v18 = vld [vmem:[%s477_s1 + $0x50] sm:$0xff]  ;;  %v30_v19 = vld [vmem:[%s477_s1 + $0x58] sm:$0xff]  ;;  %v31_v21 = vld [vmem:[%s477_s1 + $0x60] sm:$0xff]  ;;  %vm139_vm2 = vcmask 523264   ;;  %s307_s24 = smov [#allocation2]  }
   0xc   :  { %213 = vmatpush1.bf16.msra.mxu0 %v212_v9  ;;  %260 = vmatpush1.bf16.msra.mxu1 %v212_v9  ;;  %v221_v20 = vpack.c.bf16 %v30_v19, %v29_v18  ;;  %v32_v22 = vld [vmem:[%s477_s1 + $0x68] sm:$0xff]  ;;  %v33_v24 = vld [vmem:[%s477_s1 + $0x70] sm:$0xff]  ;;  %v34_v25 = vld [vmem:[%s477_s1 + $0x78] sm:$0xff]  ;;  %s188_s25 = sshll.u32 %s307_s24, 4  ;;  %s189_s25 = int_to_ptr.vmem [resolvable:$true] %s188_s25 }
   0xd   :  { %214 = vmatprep.subr.bf16.mxu0 %v305_v3  ;;  %247 = vmatprep.subr.bf16.mxu1 %v305_v3  ;;  %v224_v23 = vpack.c.bf16 %v32_v22, %v31_v21  ;;  %v227_v26 = vpack.c.bf16 %v34_v25, %v33_v24  ;;  %v35_v27 = vld [vmem:[%s477_s1 + $0x80] sm:$0xff]  ;;  %v36_v28 = vld [vmem:[%s477_s1 + $0x88] sm:$0xff]  ;;  %v37_v30 = vld [vmem:[%s477_s1 + $0x90] sm:$0xff]  ;;  %s281_s26 = scalar_lea.vmem %s189_s25, 256  ;;  %p286_p1 = scmp.lt.s32.totalorder %s189_s25, %s189_s25 }
   0xe   :  { %v230_v29 = vpack.c.bf16 %v36_v28, %v35_v27  ;;  %v38_v31 = vld [vmem:[%s477_s1 + $0x98] sm:$0xff]  ;;  %v39_v33 = vld [vmem:[%s477_s1 + $0xa0] sm:$0xff]  ;;  %v40_v34 = vld [vmem:[%s477_s1 + $0xa8] sm:$0xff]  ;;  %p282_p0 = scmp.ne.s32.totalorder %s189_s25, %s281_s26  ;;  %p287_p2 = scmp.lt.s32.totalorder %s281_s26, %s281_s26 }
   0xf   :  { %v233_v32 = vpack.c.bf16 %v38_v31, %v37_v30  ;;  %v236_v35 = vpack.c.bf16 %v40_v34, %v39_v33  ;;  %v41_v36 = vld [vmem:[%s477_s1 + $0xb0] sm:$0xff]  ;;  %v42_v37 = vld [vmem:[%s477_s1 + $0xb8] sm:$0xff]  ;;  %v43_v39 = vld [vmem:[%s477_s1 + $0xc0] sm:$0xff] }
  0x10   :  { %216 = vmatpush1.bf16.msra.mxu0 %v215_v14  ;;  %261 = vmatpush1.bf16.msra.mxu1 %v215_v14  ;;  %v239_v38 = vpack.c.bf16 %v42_v37, %v41_v36  ;;  %v44_v40 = vld [vmem:[%s477_s1 + $0xc8] sm:$0xff]  ;;  %v45_v43 = vld [vmem:[%s477_s1 + $0xd0] sm:$0x3]  ;;  %v15_v44 = vld [vmem:[%s476_s0] sm:$0xff]  ;;  %p288_p3 = por %p287_p2, %p286_p1 }
  0x11   :  { %217 = vmatprep.subr.bf16.mxu0 %v305_v3  ;;  %248 = vmatprep.subr.bf16.mxu1 %v305_v3  ;;  %v242_v41 = vpack.c.bf16 %v44_v40, %v43_v39  ;;  %v17_v45 = vld [vmem:[%s476_s0 + $0x10] sm:$0xff]  ;;  %v199_v46 = vld [vmem:[%s478_s2] ss:$0 sm:$0xff]  ;;  %v203_v10 = vld [vmem:[%s478_s2 + $0x1] ss:$0 sm:$0xff] }
  0x12   :  { %v204_v12 = vld [vmem:[%s478_s2 + $0x2] ss:$0 sm:$0xff]  ;;  %p289_p4 = pnand %p288_p3, %p282_p0 }
  0x14   :  { %219 = vmatpush1.bf16.msra.mxu0 %v218_v17  ;;  %262 = vmatpush1.bf16.msra.mxu1 %v218_v17 }
  0x15   :  { %220 = vmatprep.subr.bf16.mxu0 %v305_v3  ;;  %249 = vmatprep.subr.bf16.mxu1 %v305_v3 }
  0x18   :  { %222 = vmatpush1.bf16.msra.mxu0 %v221_v20  ;;  %263 = vmatpush1.bf16.msra.mxu1 %v221_v20 }
  0x19   :  { %223 = vmatprep.subr.bf16.mxu0 %v305_v3  ;;  %250 = vmatprep.subr.bf16.mxu1 %v305_v3 }
  0x1c   :  { %225 = vmatpush1.bf16.msra.mxu0 %v224_v23  ;;  %264 = vmatpush1.bf16.msra.mxu1 %v224_v23 }
  0x1d   :  { %226 = vmatprep.subr.bf16.mxu0 %v305_v3  ;;  %251 = vmatprep.subr.bf16.mxu1 %v305_v3 }
  0x20   :  { %228 = vmatpush1.bf16.msra.mxu0 %v227_v26  ;;  %265 = vmatpush1.bf16.msra.mxu1 %v227_v26 }
  0x21   :  { %229 = vmatprep.subr.bf16.mxu0 %v305_v3  ;;  %252 = vmatprep.subr.bf16.mxu1 %v305_v3 }
  0x24   :  { %231 = vmatpush1.bf16.msra.mxu0 %v230_v29  ;;  %266 = vmatpush1.bf16.msra.mxu1 %v230_v29 }
  0x25   :  { %232 = vmatprep.subr.bf16.mxu0 %v305_v3  ;;  %253 = vmatprep.subr.bf16.mxu1 %v305_v3 }
  0x28   :  { %234 = vmatpush1.bf16.msra.mxu0 %v233_v32  ;;  %267 = vmatpush1.bf16.msra.mxu1 %v233_v32 }
  0x29   :  { %235 = vmatprep.subr.bf16.mxu0 %v305_v3  ;;  %254 = vmatprep.subr.bf16.mxu1 %v305_v3 }
  0x2c   :  { %237 = vmatpush1.bf16.msra.mxu0 %v236_v35  ;;  %268 = vmatpush1.bf16.msra.mxu1 %v236_v35 }
  0x2d   :  { %238 = vmatprep.subr.bf16.mxu0 %v305_v3  ;;  %255 = vmatprep.subr.bf16.mxu1 %v305_v3 }
  0x30   :  { %240 = vmatpush1.bf16.msra.mxu0 %v239_v38  ;;  %269 = vmatpush1.bf16.msra.mxu1 %v239_v38 }
  0x31   :  { %241 = vmatprep.subr.bf16.mxu0 %v305_v3  ;;  %256 = vmatprep.subr.bf16.mxu1 %v305_v3 }
  0x34   :  { %243 = vmatpush1.bf16.msra.mxu0 %v242_v41  ;;  %270 = vmatpush1.bf16.msra.mxu1 %v242_v41 }
  0x35   :  { %114 = vmatprep.subr.mxu0 %v306_v42  ;;  %257 = vmatprep.subr.mxu1 %v306_v42 }
  0x38   :  { %200 = vmatpush1.msk.msra.mxu0 %vm58_vm1, %v45_v43  ;;  %271 = vmatpush1.msk.msra.mxu1 %vm58_vm1, %v45_v43 }
  0x39   :  { %127 = vmatmul.mubr.f32.vlgmr.msra.gmra.mrb[0].mxu0 %v15_v44  ;;  %132 = vmatmul.mubr.f32.vlgmr.msra.gmra.mrb[0].mxu1 %v17_v45 }
 0x10c   :  { %v128_v47 = vpop.f32.mrb[0].mxu0  ;;  %v133_v48 = vpop.f32.mrb[0].mxu1 }
 0x10d   :  { %v129_v49 = vadd.f32 %v199_v46, %v128_v47  ;;  %v130_v50 = vpop.f32.mrb[1].mxu0  ;;  %v134_v51 = vadd.f32 %v199_v46, %v133_v48  ;;  %v135_v52 = vpop.f32.mrb[1].mxu1 }
 0x10f   :  { %v137_v53 = vmax.f32 %v129_v49, 0.0  ;;  %v138_v54 = vmax.f32 %v134_v51, 0.0 }
 0x111   :  { %v140_v55 = vsel %vm139_vm2, %v137_v53, 0.0  ;;  %v143_v56 = vsel %vm139_vm2, %v138_v54, 0.0 }
 0x112   :  { %141 = vadd.xlane.f32.xlu0 %v140_v55 }
 0x116   :  { %144 = vadd.xlane.f32.xlu0 %v143_v56 }
 0x19f   :  { %v142_v57 = vpop.xlane.xlu0 %141 }
 0x1a0   :  { %v147_v58 = vmul.f32 0.015625, %v142_v57 }
 0x1a2   :  { %v149_v59 = vsub.f32 %v137_v53, %v147_v58 }
 0x1a3   :  { %v145_v60 = vpop.xlane.xlu0 %144 }
 0x1a4   :  { %v148_v61 = vmul.f32 0.015625, %v145_v60  ;;  %v151_v62 = vmul.f32 %v149_v59, %v149_v59 }
 0x1a6   :  { %v150_v63 = vsub.f32 %v138_v54, %v148_v61  ;;  %v153_v0 = vsel %vm139_vm2, %v151_v62, 0.0 }
 0x1a7   :  { %154 = vadd.xlane.f32.xlu1 %v153_v0 }
 0x1a8   :  { %v152_v1 = vmul.f32 %v150_v63, %v150_v63 }
 0x1aa   :  { %v156_v2 = vsel %vm139_vm2, %v152_v1, 0.0 }
 0x1ab   :  { %157 = vadd.xlane.f32.xlu1 %v156_v2 }
 0x234   :  { %v155_v3 = vpop.xlane.xlu1 %154 }
 0x235   :  { %v159_v4 = vmul.f32 0.015625, %v155_v3 }
 0x237   :  { %v161_v5 = vadd.f32 1e-05, %v159_v4 }
 0x238   :  { %v158_v6 = vpop.xlane.xlu1 %157 }
 0x239   :  { %277 = vrsqrt.f32 %v161_v5  ;;  %v160_v7 = vmul.f32 0.015625, %v158_v6 }
 0x23b   :  { %v162_v8 = vadd.f32 1e-05, %v160_v7 }
 0x23d   :  { %279 = vrsqrt.f32 %v162_v8 }
 0x243   :  { %v278_v9 = vpop.eup %277 }
 0x244   :  { %v165_v11 = vmul.f32 %v278_v9, %v149_v59 }
 0x246   :  { %v172_v13 = vmul.f32 %v203_v10, %v165_v11 }
 0x247   :  { %v280_v14 = vpop.eup %279 }
 0x248   :  { %v166_v15 = vmul.f32 %v280_v14, %v150_v63  ;;  %v179_v16 = vadd.f32 %v204_v12, %v172_v13 }
 0x24a   :  { %v173_v17 = vmul.f32 %v203_v10, %v166_v15  ;;  %181 = vst.msk [vmem:[#allocation2] sm:$0xff] %vm139_vm2, %v179_v16 }
 0x24c   :  { %v180_v18 = vadd.f32 %v204_v12, %v173_v17 }
 0x24e   :  { %182 = vst.msk [vmem:[#allocation2 + $0x8] sm:$0xff] %vm139_vm2, %v180_v18 }
 0x24f   :  { %292 = shalt.err (!%p289_p4)
}
 0x250   :  { %s293_s28 = scalar_lea.hbm %s479_s3, 256 }
 0x251   :  { %p294_p5 = scmp.ne.s32.totalorder %s479_s3, %s293_s28  ;;  %p297_p6 = scmp.lt.u32.totalorder %s293_s28, %s479_s3 }
 0x253   :  { %p299_p7 = pnand %p297_p6, %p294_p5 }
 0x255   :  { %302 = shalt.err (!%p299_p7)
}
 0x256   :  { %s308_s6 = smov 128   ;;  %s309_s7 = smov 8  }
 0x257   :  { %194 = dma.vmem_to_hbm [thread:$0]  %s189_s25, 256, %s479_s3, [#allocation3], %s308_s6, %s308_s6, %s309_s7  }
 0x258   :  { %303 = dma.done.wait [#allocation3], 256  }
 0x259   :  { %304 = vsyncadd [#allocation3], 4294967040 }
 0x25a   :  { %198 = vsyncpa [#allocation3], 1 }

</bundles_post_ra>
